<compile_context>
chip_gen: v6e
topology: v6e:2x2x1
jax: 0.10.0
libtpu: 0.0.40
codegen_flags: <defaults>
</compile_context>

<pallas_src>
import functools

import jax
import jax.numpy as jnp
from jax import lax
from jax.experimental import pallas as pl
from jax.experimental.pallas import tpu as pltpu


def _gblinear_kernel(sca_ref, vec_ref,
                     w1e_ref, g_ref, ws1t_ref, ws2at_ref, ws2bt_ref,
                     wgt_ref, bgc_ref, w2e_ref, rep_ref,
                     out_s_ref, out_v_ref):
    """One token tile of GBLinear, computed tokens-on-lanes (lane-dense).

    sca_ref   : [tm, S]        scalar features (natural layout)
    vec_ref   : [tm, 3V]       vector features, columns interleaved (c, d) -> 3c + d
    out_s_ref : [tm, OS]
    out_v_ref : [tm, 3OV]      columns interleaved (v, d) -> 3v + d
    Weights are small, resident, prepared host-side (see _prepare_kernel_weights).
    """
    f32 = jnp.float32
    # Contract the last dim of both operands: A[p, k] x B[m, k] -> [p, m]
    cdims = (((1,), (1,)), ((), ()))

    sca = sca_ref[...].astype(f32)   # [tm, S]
    vec = vec_ref[...].astype(f32)   # [tm, 3V]

    # --- VNLinear #1: all three xyz components in ONE MXU push --------------
    # inter_t[d*H + h, m] = sum_c w1[c, h] * feat_vector[m, c, d]
    inter_t = lax.dot_general(w1e_ref[...], vec, cdims,
                              preferred_element_type=f32)          # [3H, tm]

    # --- L2 norm over xyz (reduction done on the MXU, stays lane-dense) -----
    sq = inter_t * inter_t
    norm_t = jnp.sqrt(jnp.dot(g_ref[...], sq,
                              preferred_element_type=f32))          # [H, tm]

    # --- scalar branch -------------------------------------------------------
    z_t = lax.dot_general(ws1t_ref[...], sca, cdims,
                          preferred_element_type=f32)               # [SH, tm]

    # lin_scalar_2 on cat([vec_norm, z_sca]) -- concat folded into two matmuls.
    out_s_t = (jnp.dot(ws2at_ref[...], norm_t, preferred_element_type=f32)
               + jnp.dot(ws2bt_ref[...], z_t, preferred_element_type=f32))  # [OS, tm]
    out_s_ref[...] = out_s_t.T.astype(out_s_ref.dtype)

    # --- gating (sigmoid on VPU/EUP) -----------------------------------------
    gate_t = jax.nn.sigmoid(jnp.dot(wgt_ref[...], out_s_t,
                                    preferred_element_type=f32)
                            + bgc_ref[...])                          # [OV, tm]
    # Replicate each gate 3x along the (v, d)-interleaved row axis via a tiny matmul.
    gate_rep = jnp.dot(rep_ref[...], gate_t,
                       preferred_element_type=f32)                   # [3OV, tm]

    # --- VNLinear #2 (fused over xyz) + gating -------------------------------
    out_v_t = gate_rep * jnp.dot(w2e_ref[...], inter_t,
                                 preferred_element_type=f32)         # [3OV, tm]
    out_v_ref[...] = out_v_t.T.astype(out_v_ref.dtype)


def _prepare_kernel_weights(params):
    """Build the small, fused/transposed weight matrices consumed by the kernel."""
    w1 = params["w1"].astype(jnp.float32)      # [V, H]
    w2 = params["w2"].astype(jnp.float32)      # [H, OV]
    ws1 = params["ws1"].astype(jnp.float32)    # [S, SH]
    ws2a = params["ws2a"].astype(jnp.float32)  # [H, OS]
    ws2b = params["ws2b"].astype(jnp.float32)  # [SH, OS]
    wg = params["wg"].astype(jnp.float32)      # [OS, OV]
    bg = params["bg"].astype(jnp.float32)      # [1, OV]

    V, H = w1.shape
    OV = w2.shape[1]
    eye3 = jnp.eye(3, dtype=jnp.float32)

    # VNLinear #1 fused over xyz: rows (d, h) -> d*H + h, cols (c, d') -> 3c + d'.
    w1e = jnp.einsum("hc,de->dhce", w1.T, eye3).reshape(3 * H, 3 * V)
    # xyz sum-of-squares reduction matrix: [H, 3H] = [I_H | I_H | I_H].
    g = jnp.tile(jnp.eye(H, dtype=jnp.float32), (1, 3))
    # VNLinear #2 fused over xyz: rows (v, d) -> 3v + d, cols (d', h) -> d'*H + h.
    w2e = jnp.einsum("hv,de->vdeh", w2, eye3).reshape(3 * OV, 3 * H)
    # Gate replication matrix: (v, d) -> 3v + d rows, each equal to e_v.
    rep = jnp.repeat(jnp.eye(OV, dtype=jnp.float32), 3, axis=0)

    return dict(w1e=w1e, g=g, ws1t=ws1.T, ws2at=ws2a.T, ws2bt=ws2b.T,
                wgt=wg.T, bgc=bg.T, w2e=w2e, rep=rep)


def gblinear_forward(feat_scalar, feat_vector, params, *, tm=256):
    """feat_scalar: [B, N, in_scalar]; feat_vector: [B, N, in_vector, 3].

    tm is the token-tile size; sweep 256-512. Must be a multiple of 128.
    Inputs may be float32 or bfloat16; outputs match the input dtype.
    """
    assert tm % 128 == 0, "tm must be a multiple of 128 (lane-dense tiles)"
    B, N, S = feat_scalar.shape
    _, _, V, _ = feat_vector.shape
    M = B * N

    kw = _prepare_kernel_weights(params)
    OS = kw["ws2at"].shape[0]
    OV = kw["wgt"].shape[0]
    out_dtype = feat_scalar.dtype

    # Natural, transpose-free HBM layouts (pure reshapes -> no extra HBM passes).
    sca = feat_scalar.reshape(M, S)
    vec = feat_vector.reshape(M, V * 3)          # columns interleaved (c, d) -> 3c + d

    # Pad the token axis to a multiple of the tile size. Zero padding stays
    # finite through the whole computation (norm(0)=0, gate=sigmoid(bg)).
    Mp = pl.cdiv(M, tm) * tm
    if Mp != M:
        sca = jnp.pad(sca, ((0, Mp - M), (0, 0)))
        vec = jnp.pad(vec, ((0, Mp - M), (0, 0)))

    grid = (Mp // tm,)
    tok = lambda last: pl.BlockSpec((tm, last), lambda i: (i, 0))
    full = lambda a: pl.BlockSpec(a.shape, lambda i, _nd=a.ndim: (0,) * _nd)

    weights = [kw["w1e"], kw["g"], kw["ws1t"], kw["ws2at"], kw["ws2bt"],
               kw["wgt"], kw["bgc"], kw["w2e"], kw["rep"]]

    out_s, out_v = pl.pallas_call(
        _gblinear_kernel,
        out_shape=(
            jax.ShapeDtypeStruct((Mp, OS), out_dtype),
            jax.ShapeDtypeStruct((Mp, 3 * OV), out_dtype),
        ),
        grid_spec=pltpu.PrefetchScalarGridSpec(
            num_scalar_prefetch=0,
            grid=grid,
            in_specs=[tok(S), tok(3 * V)] + [full(w) for w in weights],
            out_specs=[tok(OS), tok(3 * OV)],
        ),
        compiler_params=pltpu.CompilerParams(
            dimension_semantics=("parallel",)),
    )(sca, vec, *weights)

    out_scalar = out_s[:M].reshape(B, N, OS)
    # (v, d) interleaved columns -> free reshape back to [..., out_vector, 3].
    out_vector = out_v[:M].reshape(B, N, OV, 3)
    return out_scalar, out_vector


def make_params(key, in_scalar, in_vector, out_scalar, out_vector,
                bottleneck=(1, 1)):
    """Deterministic parameter init mirroring GBLinear.__init__ shapes."""
    sca_bn, vec_bn = (bottleneck, bottleneck) if isinstance(bottleneck, int) else bottleneck
    assert in_vector % vec_bn == 0 and in_scalar % sca_bn == 0
    sca_hidden = in_scalar // sca_bn if sca_bn > 1 else max(in_vector, out_vector)
    hidden = in_vector // vec_bn if vec_bn > 1 else max(in_vector, out_vector)

    ks = jax.random.split(key, 6)
    scale = 0.1
    # PyTorch Linear weight shape is [out, in]; kernel consumes the transpose.
    w_vec1 = scale * jax.random.normal(ks[0], (hidden, in_vector), jnp.float32)
    w_vec2 = scale * jax.random.normal(ks[1], (out_vector, hidden), jnp.float32)
    w_s1 = scale * jax.random.normal(ks[2], (sca_hidden, in_scalar), jnp.float32)
    w_s2 = scale * jax.random.normal(ks[3], (out_scalar, hidden + sca_hidden), jnp.float32)
    w_g = scale * jax.random.normal(ks[4], (out_vector, out_scalar), jnp.float32)
    b_g = scale * jax.random.normal(ks[5], (out_vector,), jnp.float32)

    ws2_t = w_s2.T  # [hidden + sca_hidden, out_scalar]
    return {
        "w1": w_vec1.T,                 # [in_vector, hidden]
        "w2": w_vec2.T,                 # [hidden, out_vector]
        "ws1": w_s1.T,                  # [in_scalar, sca_hidden]
        "ws2a": ws2_t[:hidden],         # [hidden, out_scalar]   (acts on vec_norm)
        "ws2b": ws2_t[hidden:],         # [sca_hidden, out_scalar] (acts on z_sca)
        "wg": w_g.T,                    # [out_scalar, out_vector]
        "bg": b_g.reshape(1, out_vector),
    }


def gblinear_reference(feat_scalar, feat_vector, params):
    """Pure-JAX reference matching the PyTorch forward."""
    w1, w2 = params["w1"], params["w2"]
    ws1 = params["ws1"]
    ws2 = jnp.concatenate([params["ws2a"], params["ws2b"]], axis=0)
    wg, bg = params["wg"], params["bg"]

    # VNLinear: transpose(-2,-1) -> linear -> transpose back == einsum over channel dim.
    inter = jnp.einsum("bncd,ch->bnhd", feat_vector, w1)
    norm = jnp.linalg.norm(inter, axis=-1)
    z = feat_scalar @ ws1
    out_s = jnp.concatenate([norm, z], axis=-1) @ ws2
    gate = jax.nn.sigmoid(out_s @ wg + bg[0])[..., None]
    out_v = gate * jnp.einsum("bnhd,hv->bnvd", inter, w2)
    return out_s, out_v


if __name__ == "__main__":
    # Small but non-trivial: M = 400 tokens -> padded to 512, 2 grid steps.
    B, N = 2, 200
    in_scalar, in_vector, out_scalar, out_vector = 16, 8, 16, 8

    key = jax.random.PRNGKey(0)
    k_s, k_v, k_p = jax.random.split(key, 3)
    feat_scalar = jax.random.normal(k_s, (B, N, in_scalar), jnp.float32)
    feat_vector = jax.random.normal(k_v, (B, N, in_vector, 3), jnp.float32)
    params = make_params(k_p, in_scalar, in_vector, out_scalar, out_vector)

    fwd = jax.jit(functools.partial(gblinear_forward, tm=256))
    out_s, out_v = fwd(feat_scalar, feat_vector, params)
    jax.block_until_ready((out_s, out_v))

    ref_s, ref_v = gblinear_reference(feat_scalar, feat_vector, params)
    assert out_s.shape == ref_s.shape and out_v.shape == ref_v.shape
    assert jnp.allclose(out_s, ref_s, atol=1e-4, rtol=1e-4)
    assert jnp.allclose(out_v, ref_v, atol=1e-4, rtol=1e-4)

    print("KERNEL_OK")
</pallas_src>

<mosaic_0001>
module attributes {stable_mosaic.version = 11 : i64} {
  func.func @_gblinear_kernel(%arg0: i32, %arg1: memref<256x16xf32, #tpu.memory_space<vmem>>, %arg2: memref<256x24xf32, #tpu.memory_space<vmem>>, %arg3: memref<24x24xf32, #tpu.memory_space<vmem>>, %arg4: memref<8x24xf32, #tpu.memory_space<vmem>>, %arg5: memref<8x16xf32, #tpu.memory_space<vmem>>, %arg6: memref<16x8xf32, #tpu.memory_space<vmem>>, %arg7: memref<16x8xf32, #tpu.memory_space<vmem>>, %arg8: memref<8x16xf32, #tpu.memory_space<vmem>>, %arg9: memref<8x1xf32, #tpu.memory_space<vmem>>, %arg10: memref<24x24xf32, #tpu.memory_space<vmem>>, %arg11: memref<24x8xf32, #tpu.memory_space<vmem>>, %arg12: memref<256x16xf32, #tpu.memory_space<vmem>>, %arg13: memref<256x24xf32, #tpu.memory_space<vmem>>) attributes {dimension_semantics = [#tpu.dimension_semantics<parallel>], iteration_bounds = array<i64: 2>, scalar_prefetch = 0 : i64, scratch_operands = 0 : i64, tpu.core_type = #tpu.core_type<tc>, window_params = [{transform_indices = @transform_0, window_bounds = array<i64: 256, 16>}, {transform_indices = @transform_1, window_bounds = array<i64: 256, 24>}, {pipeline_mode = #tpu.pipeline_mode<synchronous>, transform_indices = @transform_2, window_bounds = array<i64: 24, 24>}, {pipeline_mode = #tpu.pipeline_mode<synchronous>, transform_indices = @transform_3, window_bounds = array<i64: 8, 24>}, {pipeline_mode = #tpu.pipeline_mode<synchronous>, transform_indices = @transform_4, window_bounds = array<i64: 8, 16>}, {pipeline_mode = #tpu.pipeline_mode<synchronous>, transform_indices = @transform_5, window_bounds = array<i64: 16, 8>}, {pipeline_mode = #tpu.pipeline_mode<synchronous>, transform_indices = @transform_6, window_bounds = array<i64: 16, 8>}, {pipeline_mode = #tpu.pipeline_mode<synchronous>, transform_indices = @transform_7, window_bounds = array<i64: 8, 16>}, {pipeline_mode = #tpu.pipeline_mode<synchronous>, transform_indices = @transform_8, window_bounds = array<i64: 8, 1>}, {pipeline_mode = #tpu.pipeline_mode<synchronous>, transform_indices = @transform_9, window_bounds = array<i64: 24, 24>}, {pipeline_mode = #tpu.pipeline_mode<synchronous>, transform_indices = @transform_10, window_bounds = array<i64: 24, 8>}, {transform_indices = @transform_11, window_bounds = array<i64: 256, 16>}, {transform_indices = @transform_12, window_bounds = array<i64: 256, 24>}]} {
    %c0 = arith.constant 0 : index
    %c0_0 = arith.constant 0 : index
    %0 = vector.load %arg1[%c0, %c0_0] : memref<256x16xf32, #tpu.memory_space<vmem>>, vector<256x16xf32>
    %c0_1 = arith.constant 0 : index
    %c0_2 = arith.constant 0 : index
    %1 = vector.load %arg2[%c0_1, %c0_2] : memref<256x24xf32, #tpu.memory_space<vmem>>, vector<256x24xf32>
    %c0_3 = arith.constant 0 : index
    %c0_4 = arith.constant 0 : index
    %2 = vector.load %arg3[%c0_3, %c0_4] : memref<24x24xf32, #tpu.memory_space<vmem>>, vector<24x24xf32>
    %cst = arith.constant dense<0.000000e+00> : vector<24x256xf32>
    %3 = tpu.matmul %2, %1, %cst {dimension_numbers = #tpu.dot_dimension_numbers<[1], [1], [0], [0], [0, 0, 1, 0], [], []>} : vector<24x24xf32>, vector<256x24xf32>, vector<24x256xf32> -> vector<24x256xf32>
    %4 = arith.mulf %3, %3 : vector<24x256xf32>
    %c0_5 = arith.constant 0 : index
    %c0_6 = arith.constant 0 : index
    %5 = vector.load %arg4[%c0_5, %c0_6] : memref<8x24xf32, #tpu.memory_space<vmem>>, vector<8x24xf32>
    %cst_7 = arith.constant dense<0.000000e+00> : vector<8x256xf32>
    %6 = tpu.matmul %5, %4, %cst_7 {dimension_numbers = #tpu.dot_dimension_numbers<[1], [0], [0], [1], [0, 0, 1, 1], [], []>} : vector<8x24xf32>, vector<24x256xf32>, vector<8x256xf32> -> vector<8x256xf32>
    %7 = math.sqrt %6 : vector<8x256xf32>
    %c0_8 = arith.constant 0 : index
    %c0_9 = arith.constant 0 : index
    %8 = vector.load %arg5[%c0_8, %c0_9] : memref<8x16xf32, #tpu.memory_space<vmem>>, vector<8x16xf32>
    %cst_10 = arith.constant dense<0.000000e+00> : vector<8x256xf32>
    %9 = tpu.matmul %8, %0, %cst_10 {dimension_numbers = #tpu.dot_dimension_numbers<[1], [1], [0], [0], [0, 0, 1, 0], [], []>} : vector<8x16xf32>, vector<256x16xf32>, vector<8x256xf32> -> vector<8x256xf32>
    %c0_11 = arith.constant 0 : index
    %c0_12 = arith.constant 0 : index
    %10 = vector.load %arg6[%c0_11, %c0_12] : memref<16x8xf32, #tpu.memory_space<vmem>>, vector<16x8xf32>
    %cst_13 = arith.constant dense<0.000000e+00> : vector<16x256xf32>
    %11 = tpu.matmul %10, %7, %cst_13 {dimension_numbers = #tpu.dot_dimension_numbers<[1], [0], [0], [1], [0, 0, 1, 1], [], []>} : vector<16x8xf32>, vector<8x256xf32>, vector<16x256xf32> -> vector<16x256xf32>
    %c0_14 = arith.constant 0 : index
    %c0_15 = arith.constant 0 : index
    %12 = vector.load %arg7[%c0_14, %c0_15] : memref<16x8xf32, #tpu.memory_space<vmem>>, vector<16x8xf32>
    %cst_16 = arith.constant dense<0.000000e+00> : vector<16x256xf32>
    %13 = tpu.matmul %12, %9, %cst_16 {dimension_numbers = #tpu.dot_dimension_numbers<[1], [0], [0], [1], [0, 0, 1, 1], [], []>} : vector<16x8xf32>, vector<8x256xf32>, vector<16x256xf32> -> vector<16x256xf32>
    %14 = arith.addf %11, %13 : vector<16x256xf32>
    %15 = tpu.transpose %14, [1, 0] : vector<16x256xf32> -> vector<256x16xf32>
    %c0_17 = arith.constant 0 : index
    %c0_18 = arith.constant 0 : index
    %16 = vector.load %arg12[%c0_17, %c0_18] : memref<256x16xf32, #tpu.memory_space<vmem>>, vector<256x16xf32>
    tpu.vector_store %arg12[%c0_17, %c0_18], %15 {strides = array<i32>} : memref<256x16xf32, #tpu.memory_space<vmem>>, vector<256x16xf32>,
    %c0_19 = arith.constant 0 : index
    %c0_20 = arith.constant 0 : index
    %17 = vector.load %arg8[%c0_19, %c0_20] : memref<8x16xf32, #tpu.memory_space<vmem>>, vector<8x16xf32>
    %cst_21 = arith.constant dense<0.000000e+00> : vector<8x256xf32>
    %18 = tpu.matmul %17, %14, %cst_21 {dimension_numbers = #tpu.dot_dimension_numbers<[1], [0], [0], [1], [0, 0, 1, 1], [], []>} : vector<8x16xf32>, vector<16x256xf32>, vector<8x256xf32> -> vector<8x256xf32>
    %c0_22 = arith.constant 0 : index
    %c0_23 = arith.constant 0 : index
    %19 = vector.load %arg9[%c0_22, %c0_23] : memref<8x1xf32, #tpu.memory_space<vmem>>, vector<8x1xf32>
    %20 = vector.broadcast %19 : vector<8x1xf32> to vector<8x256xf32>
    %21 = arith.addf %18, %20 : vector<8x256xf32>
    %22 = arith.negf %21 : vector<8x256xf32>
    %23 = math.exp %22 : vector<8x256xf32>
    %cst_24 = arith.constant 1.000000e+00 : f32
    %24 = vector.broadcast %cst_24 : f32 to vector<8x256xf32>
    %25 = arith.addf %24, %23 : vector<8x256xf32>
    %26 = arith.divf %24, %25 : vector<8x256xf32>
    %c0_25 = arith.constant 0 : index
    %c0_26 = arith.constant 0 : index
    %27 = vector.load %arg11[%c0_25, %c0_26] : memref<24x8xf32, #tpu.memory_space<vmem>>, vector<24x8xf32>
    %cst_27 = arith.constant dense<0.000000e+00> : vector<24x256xf32>
    %28 = tpu.matmul %27, %26, %cst_27 {dimension_numbers = #tpu.dot_dimension_numbers<[1], [0], [0], [1], [0, 0, 1, 1], [], []>} : vector<24x8xf32>, vector<8x256xf32>, vector<24x256xf32> -> vector<24x256xf32>
    %c0_28 = arith.constant 0 : index
    %c0_29 = arith.constant 0 : index
    %29 = vector.load %arg10[%c0_28, %c0_29] : memref<24x24xf32, #tpu.memory_space<vmem>>, vector<24x24xf32>
    %cst_30 = arith.constant dense<0.000000e+00> : vector<24x256xf32>
    %30 = tpu.matmul %29, %3, %cst_30 {dimension_numbers = #tpu.dot_dimension_numbers<[1], [0], [0], [1], [0, 0, 1, 1], [], []>} : vector<24x24xf32>, vector<24x256xf32>, vector<24x256xf32> -> vector<24x256xf32>
    %31 = arith.mulf %28, %30 : vector<24x256xf32>
    %32 = tpu.transpose %31, [1, 0] : vector<24x256xf32> -> vector<256x24xf32>
    %c0_31 = arith.constant 0 : index
    %c0_32 = arith.constant 0 : index
    %33 = vector.load %arg13[%c0_31, %c0_32] : memref<256x24xf32, #tpu.memory_space<vmem>>, vector<256x24xf32>
    tpu.vector_store %arg13[%c0_31, %c0_32], %32 {strides = array<i32>} : memref<256x24xf32, #tpu.memory_space<vmem>>, vector<256x24xf32>,
    return
  }
  func.func @transform_0(%arg0: i32) -> (i32, i32) {
    %c0_i32 = arith.constant 0 : i32
    %c0_i32_0 = arith.constant 0 : i32
    return %arg0, %c0_i32 : i32, i32
  }
  func.func @transform_1(%arg0: i32) -> (i32, i32) {
    %c0_i32 = arith.constant 0 : i32
    %c0_i32_0 = arith.constant 0 : i32
    return %arg0, %c0_i32 : i32, i32
  }
  func.func @transform_2(%arg0: i32) -> (i32, i32) {
    %c0_i32 = arith.constant 0 : i32
    %c0_i32_0 = arith.constant 0 : i32
    %c0_i32_1 = arith.constant 0 : i32
    return %c0_i32, %c0_i32_0 : i32, i32
  }
  func.func @transform_3(%arg0: i32) -> (i32, i32) {
    %c0_i32 = arith.constant 0 : i32
    %c0_i32_0 = arith.constant 0 : i32
    %c0_i32_1 = arith.constant 0 : i32
    return %c0_i32, %c0_i32_0 : i32, i32
  }
  func.func @transform_4(%arg0: i32) -> (i32, i32) {
    %c0_i32 = arith.constant 0 : i32
    %c0_i32_0 = arith.constant 0 : i32
    %c0_i32_1 = arith.constant 0 : i32
    return %c0_i32, %c0_i32_0 : i32, i32
  }
  func.func @transform_5(%arg0: i32) -> (i32, i32) {
    %c0_i32 = arith.constant 0 : i32
    %c0_i32_0 = arith.constant 0 : i32
    %c0_i32_1 = arith.constant 0 : i32
    return %c0_i32, %c0_i32_0 : i32, i32
  }
  func.func @transform_6(%arg0: i32) -> (i32, i32) {
    %c0_i32 = arith.constant 0 : i32
    %c0_i32_0 = arith.constant 0 : i32
    %c0_i32_1 = arith.constant 0 : i32
    return %c0_i32, %c0_i32_0 : i32, i32
  }
  func.func @transform_7(%arg0: i32) -> (i32, i32) {
    %c0_i32 = arith.constant 0 : i32
    %c0_i32_0 = arith.constant 0 : i32
    %c0_i32_1 = arith.constant 0 : i32
    return %c0_i32, %c0_i32_0 : i32, i32
  }
  func.func @transform_8(%arg0: i32) -> (i32, i32) {
    %c0_i32 = arith.constant 0 : i32
    %c0_i32_0 = arith.constant 0 : i32
    %c0_i32_1 = arith.constant 0 : i32
    return %c0_i32, %c0_i32_0 : i32, i32
  }
  func.func @transform_9(%arg0: i32) -> (i32, i32) {
    %c0_i32 = arith.constant 0 : i32
    %c0_i32_0 = arith.constant 0 : i32
    %c0_i32_1 = arith.constant 0 : i32
    return %c0_i32, %c0_i32_0 : i32, i32
  }
  func.func @transform_10(%arg0: i32) -> (i32, i32) {
    %c0_i32 = arith.constant 0 : i32
    %c0_i32_0 = arith.constant 0 : i32
    %c0_i32_1 = arith.constant 0 : i32
    return %c0_i32, %c0_i32_0 : i32, i32
  }
  func.func @transform_11(%arg0: i32) -> (i32, i32) {
    %c0_i32 = arith.constant 0 : i32
    %c0_i32_0 = arith.constant 0 : i32
    return %arg0, %c0_i32 : i32, i32
  }
  func.func @transform_12(%arg0: i32) -> (i32, i32) {
    %c0_i32 = arith.constant 0 : i32
    %c0_i32_0 = arith.constant 0 : i32
    return %arg0, %c0_i32 : i32, i32
  }
}

</mosaic_0001>

<bundles_post_ra>
// kernel: tile.9
= control target key start
LH: loop header
LB: loop body
LE: loop exit
PB: predicated region body
PF: predicated region fallthrough
CT: control target
= control target key end

     0   :  { %vm43_vm0 = vcmask 1047556   ;;  %vm45_vm1 = vcmask 64512   ;;  %s83_s24 = smov 8   ;;  %vm55_vm2 = vcmask 195712   ;;  %vm65_vm3 = vcmask 130112   ;;  %s127_s0 = inlined_call_operand.vmem [shape: f32[8,3,8], index: 0, kind: input, shape index: {}]   ;;  %s128_s1 = inlined_call_operand.vmem [shape: f32[8,24], index: 1, kind: output, shape index: {}]  }
   0x1   :  { %v73_v0 = vld [vmem:[%s127_s0 + $0x1c] sm:$0xf]  ;;  %v74_v1 = vld [vmem:[%s127_s0 + $0x18] sm:$0xf]  ;;  %v75_v2 = vld [vmem:[%s127_s0 + $0x14] sm:$0xf] }
   0x2   :  { %9 = vst [vmem:[#allocation0 + $0x38] sm:$0xf] %v73_v0  ;;  %14 = vst [vmem:[#allocation0 + $0x30] sm:$0xf] %v74_v1  ;;  %v76_v3 = vld [vmem:[%s127_s0 + $0x10] sm:$0xf] }
   0x3   :  { %19 = vst [vmem:[#allocation0 + $0x28] sm:$0xf] %v75_v2  ;;  %v77_v4 = vld [vmem:[%s127_s0 + $0xc] sm:$0xf]  ;;  %v78_v5 = vld [vmem:[%s127_s0 + $0x8] sm:$0xf] }
   0x4   :  { %24 = vst [vmem:[#allocation0 + $0x20] sm:$0xf] %v76_v3  ;;  %29 = vst [vmem:[#allocation0 + $0x18] sm:$0xf] %v77_v4  ;;  %v79_v6 = vld [vmem:[%s127_s0 + $0x4] sm:$0xf] }
   0x5   :  { %34 = vst [vmem:[#allocation0 + $0x10] sm:$0xf] %v78_v5  ;;  %v39_v7 = vld [vmem:[%s127_s0] sm:$0xf]  ;;  %38 = vst [vmem:[#allocation0 + $0x8] sm:$0xf] %v79_v6 }
   0x6   :  { %40 = vst [vmem:[#allocation0] sm:$0xf] %v39_v7  ;;  %s82_s0 = smov 16  }
   0xb   :  { %v50_v8 = vld [vmem:[#allocation0 + $0x2] ss:$8 sm:$0xf0]   ;;  %v42_v9 = vld [vmem:[#allocation0] ss:$8 sm:$0xf0]  }
   0xc   :  { %v60_v15 = vld [vmem:[#allocation0 + $0x1] ss:$8 sm:$0xf0]  }
   0xd   :  { %v41_v10 = vld [vmem:[#allocation0] ss:$8 sm:$0xf]   ;;  %v48_v11 = vld [vmem:[#allocation0 + $0x2] ss:$8 sm:$0xf]  }
   0xe   :  { %v52_v12 = vsel %vm43_vm0, %v50_v8, %v48_v11  ;;  %v44_v13 = vsel %vm43_vm0, %v42_v9, %v41_v10  ;;  %v58_v14 = vld [vmem:[#allocation0 + $0x1] ss:$8 sm:$0xf]  }
   0xf   :  { %53 = vrot.lane.b32.xlu0 %v52_v12, %s82_s0  ;;  %46 = vst.msk [vmem:[%s128_s1] sm:$0xff] %vm45_vm1, %v44_v13   ;;  %v62_v16 = vsel %vm43_vm0, %v60_v15, %v58_v14 }
  0x13   :  { %63 = vrot.lane.b32.xlu0 %v62_v16, %s83_s24 }
  0x81   :  { %v54_v17 = vpop.permute.xlu0 %53  }
  0x82   :  { %56 = vst.msk [vmem:[%s128_s1] sm:$0xff] %vm55_vm2, %v54_v17  }
  0x85   :  { %v64_v18 = vpop.permute.xlu0 %63  }
  0x86   :  { %66 = vst.msk [vmem:[%s128_s1] sm:$0xff] %vm65_vm3, %v64_v18  }

// kernel: gblinear_forward.1
= control target key start
LH: loop header
LB: loop body
LE: loop exit
PB: predicated region body
PF: predicated region fallthrough
CT: control target
= control target key end

     0   :  { %s1997_s21 = smov 0   ;;  %s2411_s0 = inlined_call_operand.vmem [shape: f32[512,16], index: 0, kind: input, shape index: {}]   ;;  %s2412_s1 = inlined_call_operand.vmem [shape: f32[512,24], index: 1, kind: input, shape index: {}]   ;;  %s2413_s2 = inlined_call_operand.vmem [shape: f32[24,24], index: 2, kind: input, shape index: {}]   ;;  %s2414_s3 = inlined_call_operand.vmem [shape: f32[8,24], index: 3, kind: input, shape index: {}]   ;;  %s2415_s4 = inlined_call_operand.vmem [shape: f32[8,16], index: 4, kind: input, shape index: {}]   ;;  %s2416_s5 = inlined_call_operand.vmem [shape: f32[16,8], index: 5, kind: input, shape index: {}]   ;;  %s2417_s6 = inlined_call_operand.vmem [shape: f32[16,8], index: 6, kind: input, shape index: {}]   ;;  %s2418_s7 = inlined_call_operand.vmem [shape: f32[8,16], index: 7, kind: input, shape index: {}]   ;;  %s2419_s8 = inlined_call_operand.vmem [shape: f32[8,1], index: 8, kind: input, shape index: {}]   ;;  %s2420_s9 = inlined_call_operand.vmem [shape: f32[24,24], index: 9, kind: input, shape index: {}]   ;;  %s2421_s10 = inlined_call_operand.vmem [shape: f32[24,8], index: 10, kind: input, shape index: {}]   ;;  %s2422_s11 = inlined_call_operand.vmem [shape: f32[512,16], index: 11, kind: output, shape index: {0}]   ;;  %s2423_s12 = inlined_call_operand.vmem [shape: f32[512,24], index: 12, kind: output, shape index: {1}]  }
   0x1 LB: > { %s1730_s22 = sadd.s32 4294967295, %s1928_s21   ;;  %p1734_p0 = scmp.ge.s32.totalorder %s1928_s21, 1  ;;  %s1928_s21 = sphi %s1997_s21, %s23_s21  }
   0x2   : > { %p377_p1 = scmp.lt.s32.totalorder %s1928_s21, 3 }
   0x4   : > { %p378_p2 = pnand %p1734_p0, %p377_p1 }
   0x5   : > { %s1735_s23 = sshll.u32 (!%p378_p2), %s1730_s22, 5 }
   0x6   : > { %381 = sbr.rel (%p378_p2) target bundleno = 1370 (0x55a), region = 64  ;;  %p430_p3 = scmp.lt.s32.totalorder (!%p378_p2), %s1735_s23, 63 }
   0xb   : > { %vm520_vm0 = vcmask 195584   ;;  %v2008_v0 = vld [vmem:[%s2413_s2] sm:$0xff]  ;;  %s2425_s23 = smov (!%p430_p3, %s1735_s23), 63  ;;  %v518_v33 = vld [vmem:[%s2413_s2 + $0x8] sm:$0xff]  ;;  %v519_v34 = vld [vmem:[%s2413_s2 + $0x10] sm:$0xff]  ;;  %v1930_v35 = vmov 0.0  }
   0xc   : > { %1859 = vmatprep.mubr.msk.f32.mxu0 %vm520_vm0, %v2008_v0  ;;  %s2012_s26 = sshll.u32 %s2425_s23, 3  ;;  %783 = vmatprep.mubr.f32.mxu1 %v1930_v35  ;;  %v715_v48 = vld [vmem:[%s2414_s3] sm:$0xff]  ;;  %vm805_vm1 = vcmask 130048   ;;  %vm980_vm6 = vcmask 64512  }
   0xd   : > { %s2018_s29 = scalar_lea.vmem %s2412_s1, %s2012_s26  ;;  %s2120_s18 = scalar_lea.vmem %s2411_s0, %s2012_s26  ;;  %v2136_v51 = vld [vmem:[%s2415_s4] sm:$0xff] }
   0xe   : > { %v516_v1 = vld [vmem:[%s2018_s29 + $0xf8] sm:$0xff]  ;;  %v515_v3 = vld [vmem:[%s2018_s29 + $0xf0] sm:$0xff]  ;;  %v514_v5 = vld [vmem:[%s2018_s29 + $0xe8] sm:$0xff]  ;;  %s2272_s17 = scalar_lea.vmem %s2422_s11, %s2012_s26  ;;  %s2342_s20 = scalar_lea.vmem %s2423_s12, %s2012_s26 }
   0xf   : > { %v500_v2 = vld [vmem:[%s2018_s29 + $0x78] sm:$0xff]  ;;  %1827 = vmatprep.subr.msk.mxu0 %vm520_vm0, %v516_v1  ;;  %v499_v4 = vld [vmem:[%s2018_s29 + $0x70] sm:$0xff]  ;;  %v498_v6 = vld [vmem:[%s2018_s29 + $0x68] sm:$0xff] }
  0x10   : > { %1828 = vmatpush3.xpose.msk.msra.mxu0 %vm520_vm0, %v500_v2  ;;  %v513_v7 = vld [vmem:[%s2018_s29 + $0xe0] sm:$0xff]  ;;  %v512_v9 = vld [vmem:[%s2018_s29 + $0xd8] sm:$0xff]  ;;  %v511_v11 = vld [vmem:[%s2018_s29 + $0xd0] sm:$0xff] }
  0x11   : > { %1829 = vmatprep.subr.msk.mxu0 %vm520_vm0, %v515_v3  ;;  %v497_v8 = vld [vmem:[%s2018_s29 + $0x60] sm:$0xff]  ;;  %v496_v10 = vld [vmem:[%s2018_s29 + $0x58] sm:$0xff]  ;;  %v495_v12 = vld [vmem:[%s2018_s29 + $0x50] sm:$0xff] }
  0x12   : > { %v510_v13 = vld [vmem:[%s2018_s29 + $0xc8] sm:$0xff]  ;;  %v509_v15 = vld [vmem:[%s2018_s29 + $0xc0] sm:$0xff]  ;;  %v508_v17 = vld [vmem:[%s2018_s29 + $0xb8] sm:$0xff] }
  0x13   : > { %v494_v14 = vld [vmem:[%s2018_s29 + $0x48] sm:$0xff]  ;;  %v493_v16 = vld [vmem:[%s2018_s29 + $0x40] sm:$0xff]  ;;  %v492_v18 = vld [vmem:[%s2018_s29 + $0x38] sm:$0xff] }
  0x14   : > { %1830 = vmatpush3.xpose.msk.msra.mxu0 %vm520_vm0, %v499_v4  ;;  %v507_v19 = vld [vmem:[%s2018_s29 + $0xb0] sm:$0xff]  ;;  %v506_v21 = vld [vmem:[%s2018_s29 + $0xa8] sm:$0xff]  ;;  %v505_v23 = vld [vmem:[%s2018_s29 + $0xa0] sm:$0xff] }
  0x15   : > { %1831 = vmatprep.subr.msk.mxu0 %vm520_vm0, %v514_v5  ;;  %v491_v20 = vld [vmem:[%s2018_s29 + $0x30] sm:$0xff]  ;;  %v490_v22 = vld [vmem:[%s2018_s29 + $0x28] sm:$0xff]  ;;  %v489_v24 = vld [vmem:[%s2018_s29 + $0x20] sm:$0xff] }
  0x16   : > { %v504_v25 = vld [vmem:[%s2018_s29 + $0x98] sm:$0xff]  ;;  %v503_v27 = vld [vmem:[%s2018_s29 + $0x90] sm:$0xff]  ;;  %v502_v29 = vld [vmem:[%s2018_s29 + $0x88] sm:$0xff] }
  0x17   : > { %v488_v26 = vld [vmem:[%s2018_s29 + $0x18] sm:$0xff]  ;;  %v487_v28 = vld [vmem:[%s2018_s29 + $0x10] sm:$0xff]  ;;  %v486_v30 = vld [vmem:[%s2018_s29 + $0x8] sm:$0xff] }
  0x18   : > { %1832 = vmatpush3.xpose.msk.msra.mxu0 %vm520_vm0, %v498_v6  ;;  %v501_v31 = vld [vmem:[%s2018_s29 + $0x80] sm:$0xff]  ;;  %v484_v49 = vld [vmem:[%s2120_s18 + $0xf8] sm:$0xff]  ;;  %v483_v52 = vld [vmem:[%s2120_s18 + $0xf0] sm:$0xff] }
  0x19   : > { %1833 = vmatprep.subr.msk.mxu0 %vm520_vm0, %v513_v7  ;;  %v485_v32 = vld [vmem:[%s2018_s29] sm:$0xff]  ;;  %v468_v50 = vld [vmem:[%s2120_s18 + $0x78] sm:$0xff]  ;;  %v467_v53 = vld [vmem:[%s2120_s18 + $0x70] sm:$0xff] }
  0x1a   : > { %v482_v54 = vld [vmem:[%s2120_s18 + $0xe8] sm:$0xff]  ;;  %v481_v56 = vld [vmem:[%s2120_s18 + $0xe0] sm:$0xff]  ;;  %v480_v58 = vld [vmem:[%s2120_s18 + $0xd8] sm:$0xff] }
  0x1b   : > { %v466_v55 = vld [vmem:[%s2120_s18 + $0x68] sm:$0xff]  ;;  %v465_v57 = vld [vmem:[%s2120_s18 + $0x60] sm:$0xff]  ;;  %v464_v59 = vld [vmem:[%s2120_s18 + $0x58] sm:$0xff] }
  0x1c   : > { %1834 = vmatpush3.xpose.msk.msra.mxu0 %vm520_vm0, %v497_v8  ;;  %v479_v60 = vld [vmem:[%s2120_s18 + $0xd0] sm:$0xff]  ;;  %v478_v62 = vld [vmem:[%s2120_s18 + $0xc8] sm:$0xff]  ;;  %v461_v1 = vld [vmem:[%s2120_s18 + $0x40] sm:$0xff] }
  0x1d   : > { %1835 = vmatprep.subr.msk.mxu0 %vm520_vm0, %v512_v9  ;;  %v463_v61 = vld [vmem:[%s2120_s18 + $0x50] sm:$0xff]  ;;  %v462_v63 = vld [vmem:[%s2120_s18 + $0x48] sm:$0xff]  ;;  %v476_v2 = vld [vmem:[%s2120_s18 + $0xb8] sm:$0xff] }
  0x1e   : > { %v460_v3 = vld [vmem:[%s2120_s18 + $0x38] sm:$0xff]  ;;  %v475_v4 = vld [vmem:[%s2120_s18 + $0xb0] sm:$0xff]  ;;  %v474_v6 = vld [vmem:[%s2120_s18 + $0xa8] sm:$0xff] }
  0x1f   : > { %v459_v5 = vld [vmem:[%s2120_s18 + $0x30] sm:$0xff]  ;;  %v458_v7 = vld [vmem:[%s2120_s18 + $0x28] sm:$0xff]  ;;  %v473_v8 = vld [vmem:[%s2120_s18 + $0xa0] sm:$0xff] }
  0x20   : > { %1836 = vmatpush3.xpose.msk.msra.mxu0 %vm520_vm0, %v496_v10  ;;  %v457_v9 = vld [vmem:[%s2120_s18 + $0x20] sm:$0xff]  ;;  %v472_v10 = vld [vmem:[%s2120_s18 + $0x98] sm:$0xff] }
  0x21   : > { %1837 = vmatprep.subr.msk.mxu0 %vm520_vm0, %v511_v11  ;;  %v456_v11 = vld [vmem:[%s2120_s18 + $0x18] sm:$0xff] }
  0x24   : > { %1838 = vmatpush3.xpose.msk.msra.mxu0 %vm520_vm0, %v495_v12  ;;  %v471_v12 = vld [vmem:[%s2120_s18 + $0x90] sm:$0xff] }
  0x25   : > { %1839 = vmatprep.subr.msk.mxu0 %vm520_vm0, %v510_v13  ;;  %v455_v13 = vld [vmem:[%s2120_s18 + $0x10] sm:$0xff] }
  0x28   : > { %1840 = vmatpush3.xpose.msk.msra.mxu0 %vm520_vm0, %v494_v14  ;;  %v470_v14 = vld [vmem:[%s2120_s18 + $0x88] sm:$0xff] }
  0x29   : > { %1841 = vmatprep.subr.msk.mxu0 %vm520_vm0, %v509_v15  ;;  %v454_v15 = vld [vmem:[%s2120_s18 + $0x8] sm:$0xff] }
  0x2c   : > { %1842 = vmatpush3.xpose.msk.msra.mxu0 %vm520_vm0, %v493_v16  ;;  %v469_v16 = vld [vmem:[%s2120_s18 + $0x80] sm:$0xff] }
  0x2d   : > { %1843 = vmatprep.subr.msk.mxu0 %vm520_vm0, %v508_v17  ;;  %v453_v17 = vld [vmem:[%s2120_s18] sm:$0xff] }
  0x30   : > { %1844 = vmatpush3.xpose.msk.msra.mxu0 %vm520_vm0, %v492_v18  ;;  %v1244_v18 = vld [vmem:[%s2419_s8] sm:$0xff] }
  0x31   : > { %1845 = vmatprep.subr.msk.mxu0 %vm520_vm0, %v507_v19  ;;  %v1931_v19 = vmov 0  }
  0x32   : > { %1909 = vset.pattern.permute.xlu0 %v1931_v19 }
  0x33   : > { %1247 = vperm.xlu0 %1909, %v1244_v18  }
  0x34   : > { %1846 = vmatpush3.xpose.msk.msra.mxu0 %vm520_vm0, %v491_v20 }
  0x35   : > { %1847 = vmatprep.subr.msk.mxu0 %vm520_vm0, %v506_v21 }
  0x38   : > { %1848 = vmatpush3.xpose.msk.msra.mxu0 %vm520_vm0, %v490_v22 }
  0x39   : > { %1849 = vmatprep.subr.msk.mxu0 %vm520_vm0, %v505_v23 }
  0x3c   : > { %1850 = vmatpush3.xpose.msk.msra.mxu0 %vm520_vm0, %v489_v24 }
  0x3d   : > { %1851 = vmatprep.subr.msk.mxu0 %vm520_vm0, %v504_v25 }
  0x40   : > { %1852 = vmatpush3.xpose.msk.msra.mxu0 %vm520_vm0, %v488_v26 }
  0x41   : > { %1853 = vmatprep.subr.msk.mxu0 %vm520_vm0, %v503_v27 }
  0x44   : > { %1854 = vmatpush3.xpose.msk.msra.mxu0 %vm520_vm0, %v487_v28 }
  0x45   : > { %1855 = vmatprep.subr.msk.mxu0 %vm520_vm0, %v502_v29 }
  0x48   : > { %1856 = vmatpush3.xpose.msk.msra.mxu0 %vm520_vm0, %v486_v30 }
  0x49   : > { %1857 = vmatprep.subr.msk.mxu0 %vm520_vm0, %v501_v31  ;;  %v976_v31 = vld [vmem:[%s2416_s5] sm:$0xff] }
  0x4c   : > { %1858 = vmatpush3.xpose.msk.msra.mxu0 %vm520_vm0, %v485_v32 }
  0x4f   : > { %1860 = vmatmul.mubr.msk.f32.vlgmr.msra.gmra.mxu0 %vm520_vm0, %v2008_v0  ;;  %v477_v0 = vld [vmem:[%s2120_s18 + $0xc0] sm:$0xff] }
  0x50   : > { %1861 = vmatprep.mubr.msk.f32.mxu0 %vm520_vm0, %v518_v33 }
  0x53   : > { %1862 = vmatmul.mubr.msk.f32.gmra.mxu0 %vm520_vm0, %v518_v33  ;;  %v977_v33 = vld [vmem:[%s2416_s5 + $0x8] sm:$0xff] }
  0x54   : > { %1863 = vmatprep.mubr.msk.f32.mxu0 %vm520_vm0, %v519_v34 }
  0x57   : > { %1864 = vmatmul.mubr.msk.f32.gmra.mxu0 %vm520_vm0, %v519_v34 }
  0x58   : > { %1134 = vmatprep.mubr.f32.mxu0 %v1930_v35 }
 0x10f   : > { %v2098_v36 = vpop.f32.mrf.mxu0 }
 0x110   : > { %v709_v47 = vmul.f32 %v2098_v36, %v2098_v36 }
 0x111   : > { %v2100_v37 = vpop.f32.mrf.mxu0 }
 0x112   : > { %v710_v46 = vmul.f32 %v2100_v37, %v2100_v37 }
 0x113   : > { %v2102_v38 = vpop.f32.mrf.mxu0 }
 0x114   : > { %v711_v45 = vmul.f32 %v2102_v38, %v2102_v38 }
 0x115   : > { %v2104_v39 = vpop.f32.mrf.mxu0 }
 0x116   : > { %v712_v44 = vmul.f32 %v2104_v39, %v2104_v39 }
 0x117   : > { %v2106_v40 = vpop.f32.mrf.mxu0 }
 0x118   : > { %v713_v43 = vmul.f32 %v2106_v40, %v2106_v40 }
 0x119   : > { %v2108_v41 = vpop.f32.mrf.mxu0 }
 0x11a   : > { %v714_v42 = vmul.f32 %v2108_v41, %v2108_v41 }
 0x11c   : > { %745 = vmatprep.subr.mxu1 %v714_v42 }
 0x11d   : > { %746 = vmatpush1.msra.mxu1 %v713_v43  ;;  %v978_v43 = vld [vmem:[%s2417_s6] sm:$0xff] }
 0x11e   : > { %747 = vmatprep.subr.mxu1 %v712_v44  ;;  %v979_v44 = vld [vmem:[%s2417_s6 + $0x8] sm:$0xff] }
 0x11f   : > { %748 = vmatpush1.msra.mxu1 %v711_v45 }
 0x120   : > { %749 = vmatprep.subr.mxu1 %v710_v46 }
 0x121   : > { %750 = vmatpush1.msra.mxu1 %v709_v47 }
 0x122   : > { %1778 = vmatmul.mubr.msk.f32.vlgmr.msra.gmra.mxu1 %vm520_vm0, %v715_v48  ;;  %1865 = vmatprep.subr.msk.mxu1 %vm805_vm1, %v484_v49 }
 0x123   : > { %1866 = vmatpush3.xpose.msk.msra.mxu1 %vm805_vm1, %v468_v50  ;;  %1897 = vmatprep.mubr.msk.f32.mxu1 %vm805_vm1, %v2136_v51 }
 0x124   : > { %1867 = vmatprep.subr.msk.mxu1 %vm805_vm1, %v483_v52 }
 0x127   : > { %1868 = vmatpush3.xpose.msk.msra.mxu1 %vm805_vm1, %v467_v53 }
 0x128   : > { %1869 = vmatprep.subr.msk.mxu1 %vm805_vm1, %v482_v54 }
 0x12b   : > { %1870 = vmatpush3.xpose.msk.msra.mxu1 %vm805_vm1, %v466_v55 }
 0x12c   : > { %1871 = vmatprep.subr.msk.mxu1 %vm805_vm1, %v481_v56 }
 0x12f   : > { %1872 = vmatpush3.xpose.msk.msra.mxu1 %vm805_vm1, %v465_v57  ;;  %v1243_v57 = vld [vmem:[%s2418_s7] sm:$0xff] }
 0x130   : > { %1873 = vmatprep.subr.msk.mxu1 %vm805_vm1, %v480_v58  ;;  %v1431_v58 = vld [vmem:[%s2420_s9] sm:$0xff] }
 0x133   : > { %1874 = vmatpush3.xpose.msk.msra.mxu1 %vm805_vm1, %v464_v59 }
 0x134   : > { %1875 = vmatprep.subr.msk.mxu1 %vm805_vm1, %v479_v60 }
 0x137   : > { %1876 = vmatpush3.xpose.msk.msra.mxu1 %vm805_vm1, %v463_v61 }
 0x138   : > { %1877 = vmatprep.subr.msk.mxu1 %vm805_vm1, %v478_v62 }
 0x13b   : > { %1878 = vmatpush3.xpose.msk.msra.mxu1 %vm805_vm1, %v462_v63 }
 0x13c   : > { %1879 = vmatprep.subr.msk.mxu1 %vm805_vm1, %v477_v0 }
 0x13f   : > { %1880 = vmatpush3.xpose.msk.msra.mxu1 %vm805_vm1, %v461_v1 }
 0x140   : > { %1881 = vmatprep.subr.msk.mxu1 %vm805_vm1, %v476_v2 }
 0x143   : > { %1882 = vmatpush3.xpose.msk.msra.mxu1 %vm805_vm1, %v460_v3  ;;  %v1336_v3 = vld [vmem:[%s2421_s10] sm:$0xff] }
 0x144   : > { %1883 = vmatprep.subr.msk.mxu1 %vm805_vm1, %v475_v4 }
 0x147   : > { %1884 = vmatpush3.xpose.msk.msra.mxu1 %vm805_vm1, %v459_v5  ;;  %v1337_v5 = vld [vmem:[%s2421_s10 + $0x8] sm:$0xff] }
 0x148   : > { %1885 = vmatprep.subr.msk.mxu1 %vm805_vm1, %v474_v6  ;;  %v1338_v6 = vld [vmem:[%s2421_s10 + $0x10] sm:$0xff] }
 0x14b   : > { %1886 = vmatpush3.xpose.msk.msra.mxu1 %vm805_vm1, %v458_v7 }
 0x14c   : > { %1887 = vmatprep.subr.msk.mxu1 %vm805_vm1, %v473_v8 }
 0x14f   : > { %1888 = vmatpush3.xpose.msk.msra.mxu1 %vm805_vm1, %v457_v9 }
 0x150   : > { %1889 = vmatprep.subr.msk.mxu1 %vm805_vm1, %v472_v10 }
 0x153   : > { %1890 = vmatpush3.xpose.msk.msra.mxu1 %vm805_vm1, %v456_v11 }
 0x154   : > { %1891 = vmatprep.subr.msk.mxu1 %vm805_vm1, %v471_v12 }
 0x157   : > { %1892 = vmatpush3.xpose.msk.msra.mxu1 %vm805_vm1, %v455_v13 }
 0x158   : > { %1893 = vmatprep.subr.msk.mxu1 %vm805_vm1, %v470_v14 }
 0x15b   : > { %1894 = vmatpush3.xpose.msk.msra.mxu1 %vm805_vm1, %v454_v15 }
 0x15c   : > { %1895 = vmatprep.subr.msk.mxu1 %vm805_vm1, %v469_v16 }
 0x15f   : > { %1896 = vmatpush3.xpose.msk.msra.mxu1 %vm805_vm1, %v453_v17 }
 0x162   : > { %1898 = vmatmul.mubr.msk.f32.vlgmr.msra.gmra.mxu1 %vm805_vm1, %v2136_v51 }
 0x163   : > { %1051 = vmatprep.mubr.f32.mxu1 %v1930_v35 }
 0x1e2   : > { %v785_v20 = vpop.f32.mrf.mxu1 }
 0x1e3   : > { %1910 = vrsqrt.f32 %v785_v20  ;;  %vm792_vm2 = vcmp.eq.f32.partialorder %v785_v20, inf  ;;  %v795_v29 = vand.u32 2147483648, %v785_v20  ;;  %vm794_vm5 = vcmp.eq.f32.partialorder %v785_v20, 0.0 }
 0x1e4   : > { %v787_v21 = vpop.f32.mrf.mxu1 }
 0x1e5   : > { %1912 = vrsqrt.f32 %v787_v21  ;;  %vm799_vm3 = vcmp.eq.f32.partialorder %v787_v21, inf  ;;  %v802_v26 = vand.u32 2147483648, %v787_v21  ;;  %vm801_vm4 = vcmp.eq.f32.partialorder %v787_v21, 0.0 }
 0x1f0   : > { %v1911_v22 = vpop.eup %1910 }
 0x1f1   : > { %v791_v23 = vmul.f32 %v1911_v22, %v785_v20 }
 0x1f2   : > { %v1913_v24 = vpop.eup %1912 }
 0x1f3   : > { %v798_v25 = vmul.f32 %v1913_v24, %v787_v21  ;;  %v793_v27 = vsel %vm792_vm2, %v785_v20, %v791_v23 }
 0x1f4   : > { %v796_v32 = vsel %vm794_vm5, %v795_v29, %v793_v27 }
 0x1f5   : > { %v800_v28 = vsel %vm799_vm3, %v787_v21, %v798_v25 }
 0x1f6   : > { %v803_v30 = vsel %vm801_vm4, %v802_v26, %v800_v28 }
 0x1f7   : > { %1100 = vmatprep.subr.mxu0 %v803_v30 }
 0x1f8   : > { %1101 = vmatpush1.msra.mxu0 %v796_v32 }
 0x1f9   : > { %1814 = vmatmul.mubr.msk.f32.vlgmr.msra.gmra.mxu0 %vm980_vm6, %v976_v31 }
 0x1fa   : > { %1140 = vmatprep.mubr.f32.mxu0 %v1930_v35 }
 0x1fd   : > { %1815 = vmatmul.mubr.msk.f32.gmra.mxu0 %vm980_vm6, %v977_v33 }
 0x1fe   : > { %1412 = vmatprep.mubr.f32.mxu0 %v1930_v35 }
 0x222   : > { %v971_v34 = vpop.f32.mrf.mxu1 }
 0x224   : > { %v973_v42 = vpop.f32.mrf.mxu1 }
 0x225   : > { %1017 = vmatprep.subr.mxu1 %v973_v42 }
 0x226   : > { %1018 = vmatpush1.msra.mxu1 %v971_v34 }
 0x227   : > { %1812 = vmatmul.mubr.msk.f32.vlgmr.msra.gmra.mxu1 %vm980_vm6, %v978_v43 }
 0x228   : > { %1057 = vmatprep.mubr.f32.mxu1 %v1930_v35 }
 0x22b   : > { %1813 = vmatmul.mubr.msk.f32.gmra.mxu1 %vm980_vm6, %v979_v44 }
 0x22c   : > { %1317 = vmatprep.mubr.f32.mxu1 %v1930_v35 }
 0x2b9   : > { %v1136_v45 = vpop.f32.mrf.mxu0 }
 0x2bb   : > { %v1138_v46 = vpop.f32.mrf.mxu0 }
 0x2bd   : > { %v1142_v50 = vpop.f32.mrf.mxu0 }
 0x2bf   : > { %v1144_v54 = vpop.f32.mrf.mxu0 }
 0x2e7   : > { %v1053_v47 = vpop.f32.mrf.mxu1 }
 0x2e8   : > { %v1137_v48 = vadd.f32 %v1136_v45, %v1053_v47 }
 0x2e9   : > { %v1055_v49 = vpop.f32.mrf.mxu1 }
 0x2ea   : > { %v1139_v51 = vadd.f32 %v1138_v46, %v1055_v49  ;;  %1147 = vxpose.xlu0.b32.start [1/2] (short) %v1137_v48, 128 }
 0x2eb   : > { %v1059_v52 = vpop.f32.mrf.mxu1 }
 0x2ec   : > { %v1143_v53 = vadd.f32 %v1142_v50, %v1059_v52  ;;  %1179 = vxpose.xlu1.b32.start [1/2] (short) %v1139_v51, 128 }
 0x2ed   : > { %v1061_v55 = vpop.f32.mrf.mxu1 }
 0x2ee   : > { %v1145_v56 = vadd.f32 %v1144_v54, %v1061_v55  ;;  %1148 = vxpose.xlu0.b32.end [2/2] (short) %v1143_v53, 128 }
 0x2f0   : > { %1180 = vxpose.xlu1.b32.end [2/2] (short) %v1145_v56, 128  ;;  %1281 = vmatprep.subr.mxu1 %v1145_v56 }
 0x2f1   : > { %1282 = vmatpush1.msra.mxu1 %v1143_v53 }
 0x2f2   : > { %1283 = vmatprep.subr.mxu1 %v1139_v51 }
 0x2f3   : > { %1284 = vmatpush1.msra.mxu1 %v1137_v48 }
 0x2f4   : > { %1816 = vmatmul.mubr.msk.f32.vlgmr.msra.gmra.mxu1 %vm805_vm1, %v1243_v57  ;;  %1469 = vmatprep.subr.mxu1 %v2108_v41 }
 0x2f5   : > { %1470 = vmatpush1.msra.mxu1 %v2106_v40  ;;  %1507 = vmatprep.mubr.f32.mxu1 %v1930_v35  ;;  %v1432_v40 = vld [vmem:[%s2420_s9 + $0x8] sm:$0xff] }
 0x2f6   : > { %1471 = vmatprep.subr.mxu1 %v2104_v39 }
 0x2f7   : > { %1472 = vmatpush1.msra.mxu1 %v2102_v38 }
 0x2f8   : > { %1473 = vmatprep.subr.mxu1 %v2100_v37  ;;  %v1248_v37 = vpop.permute.xlu0 %1247 }
 0x2f9   : > { %1474 = vmatpush1.msra.mxu1 %v2098_v36  ;;  %v1433_v36 = vld [vmem:[%s2420_s9 + $0x10] sm:$0xff] }
 0x2fa   : > { %1822 = vmatmul.mubr.msk.f32.vlgmr.msra.gmra.mxu1 %vm520_vm0, %v1431_v58 }
 0x2fb   : > { %1513 = vmatprep.mubr.f32.mxu1 %v1930_v35 }
 0x2fe   : > { %1823 = vmatmul.mubr.msk.f32.gmra.mxu1 %vm520_vm0, %v1432_v40 }
 0x2ff   : > { %1519 = vmatprep.mubr.f32.mxu1 %v1930_v35 }
 0x302   : > { %1824 = vmatmul.mubr.msk.f32.gmra.mxu1 %vm520_vm0, %v1433_v36 }
 0x368   : > { %v1195_v7 = vpop.trf.xlu1 }
 0x369   : > { %1227 = vst.msk [vmem:[%s2272_s17 + $0x80] sm:$0xff] %vm805_vm1, %v1195_v7 }
 0x36c   : > { %v1196_v9 = vpop.trf.xlu1 }
 0x36d   : > { %1228 = vst.msk [vmem:[%s2272_s17 + $0x88] sm:$0xff] %vm805_vm1, %v1196_v9 }
 0x370   : > { %v1197_v11 = vpop.trf.xlu1 }
 0x371   : > { %1229 = vst.msk [vmem:[%s2272_s17 + $0x90] sm:$0xff] %vm805_vm1, %v1197_v11 }
 0x374   : > { %v1198_v13 = vpop.trf.xlu1 }
 0x375   : > { %1230 = vst.msk [vmem:[%s2272_s17 + $0x98] sm:$0xff] %vm805_vm1, %v1198_v13 }
 0x378   : > { %v1199_v15 = vpop.trf.xlu1 }
 0x379   : > { %1231 = vst.msk [vmem:[%s2272_s17 + $0xa0] sm:$0xff] %vm805_vm1, %v1199_v15 }
 0x37c   : > { %v1200_v17 = vpop.trf.xlu1 }
 0x37d   : > { %1232 = vst.msk [vmem:[%s2272_s17 + $0xa8] sm:$0xff] %vm805_vm1, %v1200_v17 }
 0x380   : > { %v1201_v19 = vpop.trf.xlu1 }
 0x381   : > { %1233 = vst.msk [vmem:[%s2272_s17 + $0xb0] sm:$0xff] %vm805_vm1, %v1201_v19 }
 0x384   : > { %v1202_v21 = vpop.trf.xlu1 }
 0x385   : > { %1234 = vst.msk [vmem:[%s2272_s17 + $0xb8] sm:$0xff] %vm805_vm1, %v1202_v21 }
 0x388   : > { %v1203_v23 = vpop.trf.xlu1 }
 0x389   : > { %1235 = vst.msk [vmem:[%s2272_s17 + $0xc0] sm:$0xff] %vm805_vm1, %v1203_v23 }
 0x38c   : > { %v1204_v25 = vpop.trf.xlu1 }
 0x38d   : > { %1236 = vst.msk [vmem:[%s2272_s17 + $0xc8] sm:$0xff] %vm805_vm1, %v1204_v25 }
 0x390   : > { %v1205_v27 = vpop.trf.xlu1 }
 0x391   : > { %1237 = vst.msk [vmem:[%s2272_s17 + $0xd0] sm:$0xff] %vm805_vm1, %v1205_v27 }
 0x394   : > { %v1206_v29 = vpop.trf.xlu1 }
 0x395   : > { %1238 = vst.msk [vmem:[%s2272_s17 + $0xd8] sm:$0xff] %vm805_vm1, %v1206_v29 }
 0x398   : > { %v1207_v31 = vpop.trf.xlu1 }
 0x399   : > { %1239 = vst.msk [vmem:[%s2272_s17 + $0xe0] sm:$0xff] %vm805_vm1, %v1207_v31 }
 0x39c   : > { %v1208_v33 = vpop.trf.xlu1 }
 0x39d   : > { %1240 = vst.msk [vmem:[%s2272_s17 + $0xe8] sm:$0xff] %vm805_vm1, %v1208_v33 }
 0x3a0   : > { %v1209_v42 = vpop.trf.xlu1 }
 0x3a1   : > { %1241 = vst.msk [vmem:[%s2272_s17 + $0xf0] sm:$0xff] %vm805_vm1, %v1209_v42 }
 0x3a4   : > { %v1210_v44 = vpop.trf.xlu1 }
 0x3a5   : > { %1242 = vst.msk [vmem:[%s2272_s17 + $0xf8] sm:$0xff] %vm805_vm1, %v1210_v44 }
 0x3b4   : > { %v1319_v38 = vpop.f32.mrf.mxu1 }
 0x3b5   : > { %v1320_v39 = vadd.f32 %v1319_v38, %v1248_v37 }
 0x3b6   : > { %v1321_v41 = vpop.f32.mrf.mxu1 }
 0x3b7   : > { %v1817_v59 = vmul.f32 -1.442695, %v1320_v39  ;;  %v1322_v60 = vadd.f32 %v1321_v41, %v1248_v37 }
 0x3b9   : > { %1914 = vpow2.f32 %v1817_v59  ;;  %v1818_v61 = vmul.f32 -1.442695, %v1322_v60 }
 0x3ba   : > { %v1509_v45 = vpop.f32.mrf.mxu1 }
 0x3bb   : > { %1916 = vpow2.f32 %v1818_v61 }
 0x3bc   : > { %v1511_v46 = vpop.f32.mrf.mxu1 }
 0x3be   : > { %v1515_v47 = vpop.f32.mrf.mxu1 }
 0x3c0   : > { %v1517_v51 = vpop.f32.mrf.mxu1 }
 0x3c2   : > { %v1521_v56 = vpop.f32.mrf.mxu1 }
 0x3c4   : > { %v1523_v37 = vpop.f32.mrf.mxu1 }
 0x3c6   : > { %v1915_v62 = vpop.eup %1914 }
 0x3c7   : > { %v1330_v0 = vadd.f32 1.0, %v1915_v62 }
 0x3c8   : > { %v1917_v63 = vpop.eup %1916 }
 0x3c9   : > { %v1331_v1 = vadd.f32 1.0, %v1917_v63 }
 0x3cb   : > { %1918 = vrcp.f32 %v1331_v1 }
 0x3cc   : > { %1920 = vrcp.f32 %v1330_v0 }
 0x3d8   : > { %v1919_v2 = vpop.eup %1918 }
 0x3d9   : > { %v1921_v4 = vpop.eup %1920  ;;  %1378 = vmatprep.subr.mxu0 %v1919_v2 }
 0x3da   : > { %1379 = vmatpush1.msra.mxu0 %v1921_v4 }
 0x3db   : > { %1819 = vmatmul.mubr.msk.f32.vlgmr.msra.gmra.mxu0 %vm980_vm6, %v1336_v3 }
 0x3dc   : > { %1418 = vmatprep.mubr.f32.mxu0 %v1930_v35 }
 0x3df   : > { %1820 = vmatmul.mubr.msk.f32.gmra.mxu0 %vm980_vm6, %v1337_v5 }
 0x3e0   : > { %1424 = vmatprep.mubr.f32.mxu0 %v1930_v35  ;;  %v1163_v35 = vpop.trf.xlu0 }
 0x3e1   : > { %1211 = vst.msk [vmem:[%s2272_s17] sm:$0xff] %vm805_vm1, %v1163_v35 }
 0x3e3   : > { %1821 = vmatmul.mubr.msk.f32.gmra.mxu0 %vm980_vm6, %v1338_v6 }
 0x3e4   : > { %v1164_v8 = vpop.trf.xlu0 }
 0x3e5   : > { %1212 = vst.msk [vmem:[%s2272_s17 + $0x8] sm:$0xff] %vm805_vm1, %v1164_v8 }
 0x3e8   : > { %v1165_v10 = vpop.trf.xlu0 }
 0x3e9   : > { %1213 = vst.msk [vmem:[%s2272_s17 + $0x10] sm:$0xff] %vm805_vm1, %v1165_v10 }
 0x3ec   : > { %v1166_v12 = vpop.trf.xlu0 }
 0x3ed   : > { %1214 = vst.msk [vmem:[%s2272_s17 + $0x18] sm:$0xff] %vm805_vm1, %v1166_v12 }
 0x3f0   : > { %v1167_v14 = vpop.trf.xlu0 }
 0x3f1   : > { %1215 = vst.msk [vmem:[%s2272_s17 + $0x20] sm:$0xff] %vm805_vm1, %v1167_v14 }
 0x3f4   : > { %v1168_v16 = vpop.trf.xlu0 }
 0x3f5   : > { %1216 = vst.msk [vmem:[%s2272_s17 + $0x28] sm:$0xff] %vm805_vm1, %v1168_v16 }
 0x3f8   : > { %v1169_v18 = vpop.trf.xlu0 }
 0x3f9   : > { %1217 = vst.msk [vmem:[%s2272_s17 + $0x30] sm:$0xff] %vm805_vm1, %v1169_v18 }
 0x3fc   : > { %v1170_v20 = vpop.trf.xlu0 }
 0x3fd   : > { %1218 = vst.msk [vmem:[%s2272_s17 + $0x38] sm:$0xff] %vm805_vm1, %v1170_v20 }
 0x400   : > { %v1171_v22 = vpop.trf.xlu0 }
 0x401   : > { %1219 = vst.msk [vmem:[%s2272_s17 + $0x40] sm:$0xff] %vm805_vm1, %v1171_v22 }
 0x404   : > { %v1172_v24 = vpop.trf.xlu0 }
 0x405   : > { %1220 = vst.msk [vmem:[%s2272_s17 + $0x48] sm:$0xff] %vm805_vm1, %v1172_v24 }
 0x408   : > { %v1173_v26 = vpop.trf.xlu0 }
 0x409   : > { %1221 = vst.msk [vmem:[%s2272_s17 + $0x50] sm:$0xff] %vm805_vm1, %v1173_v26 }
 0x40c   : > { %v1174_v28 = vpop.trf.xlu0 }
 0x40d   : > { %1222 = vst.msk [vmem:[%s2272_s17 + $0x58] sm:$0xff] %vm805_vm1, %v1174_v28 }
 0x410   : > { %v1175_v30 = vpop.trf.xlu0 }
 0x411   : > { %1223 = vst.msk [vmem:[%s2272_s17 + $0x60] sm:$0xff] %vm805_vm1, %v1175_v30 }
 0x414   : > { %v1176_v32 = vpop.trf.xlu0 }
 0x415   : > { %1224 = vst.msk [vmem:[%s2272_s17 + $0x68] sm:$0xff] %vm805_vm1, %v1176_v32 }
 0x418   : > { %v1177_v34 = vpop.trf.xlu0 }
 0x419   : > { %1225 = vst.msk [vmem:[%s2272_s17 + $0x70] sm:$0xff] %vm805_vm1, %v1177_v34 }
 0x41c   : > { %v1178_v43 = vpop.trf.xlu0 }
 0x41d   : > { %1226 = vst.msk [vmem:[%s2272_s17 + $0x78] sm:$0xff] %vm805_vm1, %v1178_v43 }
 0x49b   : > { %v1414_v48 = vpop.f32.mrf.mxu0 }
 0x49c   : > { %v1526_v49 = vmul.f32 %v1509_v45, %v1414_v48 }
 0x49d   : > { %v1416_v50 = vpop.f32.mrf.mxu0 }
 0x49e   : > { %v1527_v52 = vmul.f32 %v1511_v46, %v1416_v50  ;;  %1532 = vxpose.xlu1.b32.start [1/3] (short) %v1526_v49, 128 }
 0x49f   : > { %v1420_v53 = vpop.f32.mrf.mxu0 }
 0x4a0   : > { %v1528_v54 = vmul.f32 %v1515_v47, %v1420_v53  ;;  %1564 = vxpose.xlu0.b32.start [1/3] (short) %v1527_v52, 128 }
 0x4a1   : > { %v1422_v55 = vpop.f32.mrf.mxu0 }
 0x4a2   : > { %v1529_v57 = vmul.f32 %v1517_v51, %v1422_v55  ;;  %1533 = vxpose.xlu1.b32.cont [2/3] (short) %v1528_v54, 128 }
 0x4a3   : > { %v1426_v58 = vpop.f32.mrf.mxu0 }
 0x4a4   : > { %v1530_v40 = vmul.f32 %v1521_v56, %v1426_v58  ;;  %1565 = vxpose.xlu0.b32.cont [2/3] (short) %v1529_v57, 128 }
 0x4a5   : > { %v1428_v36 = vpop.f32.mrf.mxu0 }
 0x4a6   : > { %v1531_v38 = vmul.f32 %v1523_v37, %v1428_v36  ;;  %1534 = vxpose.xlu1.b32.end [3/3] (short) %v1530_v40, 128 }
 0x4a8   : > { %1566 = vxpose.xlu0.b32.end [3/3] (short) %v1531_v38, 128 }
 0x51a   : > { %v1548_v39 = vpop.trf.xlu1 }
 0x51b   : > { %1596 = vst.msk [vmem:[%s2342_s20] sm:$0xff] %vm520_vm0, %v1548_v39 }
 0x51c   : > { %v1580_v41 = vpop.trf.xlu0 }
 0x51d   : > { %1612 = vst.msk [vmem:[%s2342_s20 + $0x80] sm:$0xff] %vm520_vm0, %v1580_v41 }
 0x51e   : > { %v1549_v59 = vpop.trf.xlu1 }
 0x51f   : > { %1597 = vst.msk [vmem:[%s2342_s20 + $0x8] sm:$0xff] %vm520_vm0, %v1549_v59 }
 0x520   : > { %v1581_v60 = vpop.trf.xlu0 }
 0x521   : > { %1613 = vst.msk [vmem:[%s2342_s20 + $0x88] sm:$0xff] %vm520_vm0, %v1581_v60 }
 0x522   : > { %v1550_v61 = vpop.trf.xlu1 }
 0x523   : > { %1598 = vst.msk [vmem:[%s2342_s20 + $0x10] sm:$0xff] %vm520_vm0, %v1550_v61 }
 0x524   : > { %v1582_v62 = vpop.trf.xlu0 }
 0x525   : > { %1614 = vst.msk [vmem:[%s2342_s20 + $0x90] sm:$0xff] %vm520_vm0, %v1582_v62 }
 0x526   : > { %v1551_v63 = vpop.trf.xlu1 }
 0x527   : > { %1599 = vst.msk [vmem:[%s2342_s20 + $0x18] sm:$0xff] %vm520_vm0, %v1551_v63 }
 0x528   : > { %v1583_v0 = vpop.trf.xlu0 }
 0x529   : > { %1615 = vst.msk [vmem:[%s2342_s20 + $0x98] sm:$0xff] %vm520_vm0, %v1583_v0 }
 0x52a   : > { %v1552_v1 = vpop.trf.xlu1 }
 0x52b   : > { %1600 = vst.msk [vmem:[%s2342_s20 + $0x20] sm:$0xff] %vm520_vm0, %v1552_v1 }
 0x52c   : > { %v1584_v2 = vpop.trf.xlu0 }
 0x52d   : > { %1616 = vst.msk [vmem:[%s2342_s20 + $0xa0] sm:$0xff] %vm520_vm0, %v1584_v2 }
 0x52e   : > { %v1553_v3 = vpop.trf.xlu1 }
 0x52f   : > { %1601 = vst.msk [vmem:[%s2342_s20 + $0x28] sm:$0xff] %vm520_vm0, %v1553_v3 }
 0x530   : > { %v1585_v4 = vpop.trf.xlu0 }
 0x531   : > { %1617 = vst.msk [vmem:[%s2342_s20 + $0xa8] sm:$0xff] %vm520_vm0, %v1585_v4 }
 0x532   : > { %v1554_v5 = vpop.trf.xlu1 }
 0x533   : > { %1602 = vst.msk [vmem:[%s2342_s20 + $0x30] sm:$0xff] %vm520_vm0, %v1554_v5 }
 0x534   : > { %v1586_v6 = vpop.trf.xlu0 }
 0x535   : > { %1618 = vst.msk [vmem:[%s2342_s20 + $0xb0] sm:$0xff] %vm520_vm0, %v1586_v6 }
 0x536   : > { %v1555_v35 = vpop.trf.xlu1 }
 0x537   : > { %1603 = vst.msk [vmem:[%s2342_s20 + $0x38] sm:$0xff] %vm520_vm0, %v1555_v35 }
 0x538   : > { %v1587_v7 = vpop.trf.xlu0 }
 0x539   : > { %1619 = vst.msk [vmem:[%s2342_s20 + $0xb8] sm:$0xff] %vm520_vm0, %v1587_v7 }
 0x53a   : > { %v1556_v8 = vpop.trf.xlu1 }
 0x53b   : > { %1604 = vst.msk [vmem:[%s2342_s20 + $0x40] sm:$0xff] %vm520_vm0, %v1556_v8 }
 0x53c   : > { %v1588_v9 = vpop.trf.xlu0 }
 0x53d   : > { %1620 = vst.msk [vmem:[%s2342_s20 + $0xc0] sm:$0xff] %vm520_vm0, %v1588_v9 }
 0x53e   : > { %v1557_v10 = vpop.trf.xlu1 }
 0x53f   : > { %1605 = vst.msk [vmem:[%s2342_s20 + $0x48] sm:$0xff] %vm520_vm0, %v1557_v10 }
 0x540   : > { %v1589_v11 = vpop.trf.xlu0 }
 0x541   : > { %1621 = vst.msk [vmem:[%s2342_s20 + $0xc8] sm:$0xff] %vm520_vm0, %v1589_v11 }
 0x542   : > { %v1558_v12 = vpop.trf.xlu1 }
 0x543   : > { %1606 = vst.msk [vmem:[%s2342_s20 + $0x50] sm:$0xff] %vm520_vm0, %v1558_v12 }
 0x544   : > { %v1590_v13 = vpop.trf.xlu0 }
 0x545   : > { %1622 = vst.msk [vmem:[%s2342_s20 + $0xd0] sm:$0xff] %vm520_vm0, %v1590_v13 }
 0x546   : > { %v1559_v14 = vpop.trf.xlu1 }
 0x547   : > { %1607 = vst.msk [vmem:[%s2342_s20 + $0x58] sm:$0xff] %vm520_vm0, %v1559_v14 }
 0x548   : > { %v1591_v15 = vpop.trf.xlu0 }
 0x549   : > { %1623 = vst.msk [vmem:[%s2342_s20 + $0xd8] sm:$0xff] %vm520_vm0, %v1591_v15 }
 0x54a   : > { %v1560_v16 = vpop.trf.xlu1 }
 0x54b   : > { %1608 = vst.msk [vmem:[%s2342_s20 + $0x60] sm:$0xff] %vm520_vm0, %v1560_v16 }
 0x54c   : > { %v1592_v17 = vpop.trf.xlu0 }
 0x54d   : > { %1624 = vst.msk [vmem:[%s2342_s20 + $0xe0] sm:$0xff] %vm520_vm0, %v1592_v17 }
 0x54e   : > { %v1561_v18 = vpop.trf.xlu1 }
 0x54f   : > { %1609 = vst.msk [vmem:[%s2342_s20 + $0x68] sm:$0xff] %vm520_vm0, %v1561_v18 }
 0x550   : > { %v1593_v19 = vpop.trf.xlu0 }
 0x551   : > { %1625 = vst.msk [vmem:[%s2342_s20 + $0xe8] sm:$0xff] %vm520_vm0, %v1593_v19 }
 0x552   : > { %v1562_v20 = vpop.trf.xlu1 }
 0x553   : > { %1610 = vst.msk [vmem:[%s2342_s20 + $0x70] sm:$0xff] %vm520_vm0, %v1562_v20 }
 0x554   : > { %v1594_v21 = vpop.trf.xlu0 }
 0x555   : > { %1626 = vst.msk [vmem:[%s2342_s20 + $0xf0] sm:$0xff] %vm520_vm0, %v1594_v21 }
 0x556   : > { %v1563_v22 = vpop.trf.xlu1 }
 0x557   : > { %1611 = vst.msk [vmem:[%s2342_s20 + $0x78] sm:$0xff] %vm520_vm0, %v1563_v22 }
 0x558   : > { %v1595_v23 = vpop.trf.xlu0 }
 0x559   : > { %1627 = vst.msk [vmem:[%s2342_s20 + $0xf8] sm:$0xff] %vm520_vm0, %v1595_v23 }
 0x55a PF: > { %s23_s21 = sadd.s32 1, %s1928_s21  }
 0x55b   : > { %p20_p4 = scmp.ge.s32.totalorder %s23_s21, 4  }
 0x55d   :  { %22 = sbr.rel (!%p20_p4) target bundleno = 1 (0x1), region = 109 }

</bundles_post_ra>
